<compile_context>
chip_gen: v5e
topology: v5e:2x2
jax: 0.10.0
libtpu: 0.0.40
codegen_flags: <defaults>
</compile_context>

<pallas_src>
import functools

import jax
import jax.numpy as jnp
from jax.experimental import pallas as pl
from jax.experimental.pallas import tpu as pltpu

LANES = 128            # output lane-padding (N <= 128 for SpuriousNet)
K_SINGLE_MAX = 2048    # single-K-block (GEMV-style) path for data_dim <= this
TK_BIG = 512           # K tile for the (rare) very-large-data_dim path
M_SINGLE_MAX = 1024    # single M block (TM = M, no row padding) up to this
TM_BIG = 512           # M tile for large batches (>= 2 blocks -> both v7x TCs)
VMEM_LIMIT = 48 * 1024 * 1024


def _round_up(x, m):
    return ((x + m - 1) // m) * m


# ----------------------------------------------------------------------------
# One-time parameter preparation (done at load time, NOT per forward call)
# ----------------------------------------------------------------------------
def prepare_params(w, b):
    """w: (output, data_dim), b: (output,) -> ((Kp, 128) f32, (1, 128) f32)."""
    n, k = w.shape
    assert n <= LANES, "SpuriousNet output dim > 128 not supported"
    kp = k if k <= K_SINGLE_MAX else _round_up(k, TK_BIG)
    w_p = jnp.pad(jnp.transpose(w).astype(jnp.float32),
                  ((0, kp - k), (0, LANES - n)))
    b_p = jnp.pad(b.reshape(1, -1).astype(jnp.float32),
                  ((0, 0), (0, LANES - n)))
    return w_p, b_p


# ----------------------------------------------------------------------------
# Kernels
# ----------------------------------------------------------------------------
def _epilogue(logits, o_ref, use_sigmoid, n_valid):
    if use_sigmoid:
        # sigmoid(z) = 0.5*(tanh(0.5*z)+1): one EUP transcendental, no overflow.
        out = 0.5 * (jnp.tanh(0.5 * logits) + 1.0)
    else:
        # softmax over the valid (un-padded) output columns
        col = jax.lax.broadcasted_iota(jnp.int32, logits.shape, 1)
        masked = jnp.where(col < n_valid, logits, -jnp.inf)
        m = jnp.max(masked, axis=-1, keepdims=True)
        e = jnp.exp(masked - m)
        denom = jnp.sum(e, axis=-1, keepdims=True)
        out = e * pl.reciprocal(denom, approx=True)
    o_ref[...] = out.astype(o_ref.dtype)


def _single_pass_kernel(x_ref, w_ref, b_ref, o_ref, *, use_sigmoid, n_valid):
    """Whole K in one block: logits = x @ W + b, then activation. No scratch."""
    logits = jnp.dot(x_ref[...], w_ref[...],
                     preferred_element_type=jnp.float32) + b_ref[...]
    _epilogue(logits, o_ref, use_sigmoid, n_valid)


def _ktiled_kernel(x_ref, w_ref, b_ref, o_ref, acc_ref, *, use_sigmoid, n_valid):
    """K-tiled accumulator path (only used for data_dim > K_SINGLE_MAX)."""
    @pl.when(pl.program_id(1) == 0)
    def _():
        acc_ref[...] = jnp.zeros_like(acc_ref)

    acc_ref[...] += jnp.dot(x_ref[...], w_ref[...],
                            preferred_element_type=jnp.float32)

    @pl.when(pl.program_id(1) == pl.num_programs(1) - 1)
    def _():
        _epilogue(acc_ref[...] + b_ref[...], o_ref, use_sigmoid, n_valid)


# ----------------------------------------------------------------------------
# Forward
# ----------------------------------------------------------------------------
def spurious_net_forward(x, w_p, b_p, *, output=1):
    """x: (M, data_dim) f32; w_p/b_p from prepare_params()."""
    m, k = x.shape
    kp, tn = w_p.shape
    assert tn == LANES
    n = output
    use_sigmoid = (output == 1)

    x = x.astype(jnp.float32)
    if kp > k:                                   # only for data_dim > K_SINGLE_MAX
        x = jnp.pad(x, ((0, 0), (0, kp - k)))

    if m <= M_SINGLE_MAX:
        tm, mp, x_in = m, m, x                   # full-extent block, no row pad
    else:
        tm = TM_BIG
        mp = _round_up(m, tm)
        x_in = jnp.pad(x, ((0, mp - m), (0, 0))) if mp > m else x

    if kp <= K_SINGLE_MAX:
        out = pl.pallas_call(
            functools.partial(_single_pass_kernel,
                              use_sigmoid=use_sigmoid, n_valid=n),
            out_shape=jax.ShapeDtypeStruct((mp, tn), jnp.float32),
            grid_spec=pltpu.PrefetchScalarGridSpec(
                num_scalar_prefetch=0,
                grid=(mp // tm,),
                in_specs=[
                    pl.BlockSpec((tm, kp), lambda i: (i, 0)),
                    pl.BlockSpec((kp, tn), lambda i: (0, 0)),   # W resident
                    pl.BlockSpec((1, tn), lambda i: (0, 0)),
                ],
                out_specs=pl.BlockSpec((tm, tn), lambda i: (i, 0)),
            ),
            compiler_params=pltpu.CompilerParams(
                dimension_semantics=("parallel",),
                vmem_limit_bytes=VMEM_LIMIT),
        )(x_in, w_p, b_p)
    else:
        tk = TK_BIG
        out = pl.pallas_call(
            functools.partial(_ktiled_kernel,
                              use_sigmoid=use_sigmoid, n_valid=n),
            out_shape=jax.ShapeDtypeStruct((mp, tn), jnp.float32),
            grid_spec=pltpu.PrefetchScalarGridSpec(
                num_scalar_prefetch=0,
                grid=(mp // tm, kp // tk),
                in_specs=[
                    pl.BlockSpec((tm, tk), lambda i, j: (i, j)),
                    pl.BlockSpec((tk, tn), lambda i, j: (j, 0)),
                    pl.BlockSpec((1, tn), lambda i, j: (0, 0)),
                ],
                out_specs=pl.BlockSpec((tm, tn), lambda i, j: (i, 0)),
                scratch_shapes=[pltpu.VMEM((tm, tn), jnp.float32)],
            ),
            compiler_params=pltpu.CompilerParams(
                dimension_semantics=("parallel", "arbitrary"),
                vmem_limit_bytes=VMEM_LIMIT),
        )(x_in, w_p, b_p)

    return out[:m, :n]


# ----------------------------------------------------------------------------
# Demo / self-test
# ----------------------------------------------------------------------------
if __name__ == "__main__":
    key = jax.random.PRNGKey(0)
    kx, kw, kb, kw2, kb2 = jax.random.split(key, 5)

    data_dim, batch = 32, 4
    bound = 1.0 / (data_dim ** 0.5)   # nn.Linear default init range
    x = jax.random.normal(kx, (batch, data_dim), jnp.float32)

    # ---- output == 1  -> sigmoid path --------------------------------------
    output = 1
    w = jax.random.uniform(kw, (output, data_dim), jnp.float32, -bound, bound)
    b = jax.random.uniform(kb, (output,), jnp.float32, -bound, bound)
    w_p, b_p = prepare_params(w, b)                      # one-time prep
    fwd_sig = jax.jit(functools.partial(spurious_net_forward, output=output))
    y = jax.block_until_ready(fwd_sig(x, w_p, b_p))
    ref = jax.nn.sigmoid(x @ w.T + b)
    assert y.shape == (batch, output), y.shape
    assert bool(jnp.all(jnp.isfinite(y)))
    assert bool(jnp.max(jnp.abs(y - ref)) < 1e-5), jnp.max(jnp.abs(y - ref))

    # ---- output > 1  -> softmax path ---------------------------------------
    output2 = 3
    w2 = jax.random.uniform(kw2, (output2, data_dim), jnp.float32, -bound, bound)
    b2 = jax.random.uniform(kb2, (output2,), jnp.float32, -bound, bound)
    w2_p, b2_p = prepare_params(w2, b2)
    fwd_soft = jax.jit(functools.partial(spurious_net_forward, output=output2))
    y2 = jax.block_until_ready(fwd_soft(x, w2_p, b2_p))
    ref2 = jax.nn.softmax(x @ w2.T + b2, axis=1)
    assert y2.shape == (batch, output2), y2.shape
    assert bool(jnp.all(jnp.isfinite(y2)))
    assert bool(jnp.max(jnp.abs(jnp.sum(y2, axis=1) - 1.0)) < 5e-3)
    assert bool(jnp.max(jnp.abs(y2 - ref2)) < 5e-3), jnp.max(jnp.abs(y2 - ref2))

    print("KERNEL_OK")
</pallas_src>

<mosaic_0001>
module attributes {stable_mosaic.version = 11 : i64} {
  func.func @_single_pass_kernel(%arg0: i32, %arg1: memref<4x32xf32, #tpu.memory_space<vmem>>, %arg2: memref<32x128xf32, #tpu.memory_space<vmem>>, %arg3: memref<1x128xf32, #tpu.memory_space<vmem>>, %arg4: memref<4x128xf32, #tpu.memory_space<vmem>>) attributes {dimension_semantics = [#tpu.dimension_semantics<parallel>], iteration_bounds = array<i64: 1>, scalar_prefetch = 0 : i64, scratch_operands = 0 : i64, tpu.core_type = #tpu.core_type<tc>, window_params = [{transform_indices = @transform_0, window_bounds = array<i64: 4, 32>}, {pipeline_mode = #tpu.pipeline_mode<synchronous>, transform_indices = @transform_1, window_bounds = array<i64: 32, 128>}, {pipeline_mode = #tpu.pipeline_mode<synchronous>, transform_indices = @transform_2, window_bounds = array<i64: 1, 128>}, {transform_indices = @transform_3, window_bounds = array<i64: 4, 128>}]} {
    %c0 = arith.constant 0 : index
    %c0_0 = arith.constant 0 : index
    %0 = vector.load %arg1[%c0, %c0_0] : memref<4x32xf32, #tpu.memory_space<vmem>>, vector<4x32xf32>
    %c0_1 = arith.constant 0 : index
    %c0_2 = arith.constant 0 : index
    %1 = vector.load %arg2[%c0_1, %c0_2] : memref<32x128xf32, #tpu.memory_space<vmem>>, vector<32x128xf32>
    %cst = arith.constant dense<0.000000e+00> : vector<4x128xf32>
    %2 = tpu.matmul %0, %1, %cst {dimension_numbers = #tpu.dot_dimension_numbers<[1], [0], [0], [1], [0, 0, 1, 1], [], []>} : vector<4x32xf32>, vector<32x128xf32>, vector<4x128xf32> -> vector<4x128xf32>
    %c0_3 = arith.constant 0 : index
    %c0_4 = arith.constant 0 : index
    %3 = vector.load %arg3[%c0_3, %c0_4] : memref<1x128xf32, #tpu.memory_space<vmem>>, vector<1x128xf32>
    %4 = vector.broadcast %3 : vector<1x128xf32> to vector<4x128xf32>
    %5 = arith.addf %2, %4 : vector<4x128xf32>
    %cst_5 = arith.constant 5.000000e-01 : f32
    %6 = vector.broadcast %cst_5 : f32 to vector<4x128xf32>
    %7 = arith.mulf %6, %5 : vector<4x128xf32>
    %8 = math.tanh %7 : vector<4x128xf32>
    %cst_6 = arith.constant 1.000000e+00 : f32
    %9 = vector.broadcast %cst_6 : f32 to vector<4x128xf32>
    %10 = arith.addf %8, %9 : vector<4x128xf32>
    %cst_7 = arith.constant 5.000000e-01 : f32
    %11 = vector.broadcast %cst_7 : f32 to vector<4x128xf32>
    %12 = arith.mulf %11, %10 : vector<4x128xf32>
    %c0_8 = arith.constant 0 : index
    %c0_9 = arith.constant 0 : index
    %13 = vector.load %arg4[%c0_8, %c0_9] : memref<4x128xf32, #tpu.memory_space<vmem>>, vector<4x128xf32>
    tpu.vector_store %arg4[%c0_8, %c0_9], %12 {strides = array<i32>} : memref<4x128xf32, #tpu.memory_space<vmem>>, vector<4x128xf32>,
    return
  }
  func.func @transform_0(%arg0: i32) -> (i32, i32) {
    %c0_i32 = arith.constant 0 : i32
    %c0_i32_0 = arith.constant 0 : i32
    return %arg0, %c0_i32 : i32, i32
  }
  func.func @transform_1(%arg0: i32) -> (i32, i32) {
    %c0_i32 = arith.constant 0 : i32
    %c0_i32_0 = arith.constant 0 : i32
    %c0_i32_1 = arith.constant 0 : i32
    return %c0_i32, %c0_i32_0 : i32, i32
  }
  func.func @transform_2(%arg0: i32) -> (i32, i32) {
    %c0_i32 = arith.constant 0 : i32
    %c0_i32_0 = arith.constant 0 : i32
    %c0_i32_1 = arith.constant 0 : i32
    return %c0_i32, %c0_i32_0 : i32, i32
  }
  func.func @transform_3(%arg0: i32) -> (i32, i32) {
    %c0_i32 = arith.constant 0 : i32
    %c0_i32_0 = arith.constant 0 : i32
    return %arg0, %c0_i32 : i32, i32
  }
}

</mosaic_0001>

<bundles_post_ra>
// kernel: spurious_net_forward.1
= control target key start
LH: loop header
LB: loop body
LE: loop exit
PB: predicated region body
PF: predicated region fallthrough
CT: control target
= control target key end

     0   :  { %8 = vsyncpa [#allocation3], 0  ;;  %s184_s0 = inlined_call_operand.hbm [shape: f32[4,32], index: 0, kind: input, shape index: {}]   ;;  %s185_s1 = inlined_call_operand.hbm [shape: f32[32,128], index: 1, kind: input, shape index: {}]   ;;  %s186_s2 = inlined_call_operand.vmem [shape: f32[1,128], index: 2, kind: input, shape index: {}]   ;;  %s187_s3 = inlined_call_operand.vmem [shape: f32[4,128], index: 3, kind: output, shape index: {}]  }
   0x1   :  { %s15_s14 = sshll.u32 %s184_s0, 4  ;;  %s16_s14 = int_to_ptr.hbm [resolvable:$true] %s15_s14 }
   0x2   :  { %9 = vsyncpa [#allocation5], 0  ;;  %s148_s15 = smov [#allocation2]   ;;  %s25_s19 = sshll.u32 %s185_s1, 4  ;;  %s26_s19 = int_to_ptr.hbm [resolvable:$true] %s25_s19 }
   0x3   :  { %s17_s16 = sshll.u32 %s148_s15, 4  ;;  %s149_s20 = smov [#allocation4]   ;;  %s18_s16 = int_to_ptr.vmem [resolvable:$true] %s17_s16 }
   0x4   :  { %20 = dma.hbm_to_vmem [thread:$0]  %s16_s14, 64, %s18_s16, [#allocation3]  }
   0x5   :  { %s27_s21 = sshll.u32 %s149_s20, 4  ;;  %s150_s22 = smov 128   ;;  %s28_s21 = int_to_ptr.vmem [resolvable:$true] %s27_s21 }
   0x6   :  { %s151_s23 = smov 8  }
   0x7   :  { %33 = dma.hbm_to_vmem [thread:$0]  %s26_s19, 512, %s28_s21, [#allocation5], %s150_s22, %s150_s22, %s151_s23  }
   0x8   :  { %144 = dma.done.wait [#allocation3], 64  }
   0x9   :  { %145 = vsyncadd [#allocation3], 4294967232 }
   0xa   :  { %146 = dma.done.wait [#allocation5], 512  }
   0xb   :  { %147 = vsyncadd [#allocation5], 4294966784  ;;  %v48_v0 = vld [vmem:[#allocation4 + $0x18] sm:$0xff]  ;;  %v47_v1 = vld [vmem:[#allocation4 + $0x10] sm:$0xff]  ;;  %vm53_vm0 = vcmask 261120  }
   0xc   :  { %69 = vmatpush.msra.mxu0 %v48_v0  ;;  %v46_v2 = vld [vmem:[#allocation4 + $0x8] sm:$0xff]  ;;  %v45_v3 = vld [vmem:[#allocation4] sm:$0xff]  ;;  %v44_v4 = vld [vmem:[#allocation2] sm:$0xf] }
   0xd   :  { %v93_v5 = vld [vmem:[%s186_s2] ss:$0 sm:$0xff] }
   0xe   :  { %70 = vmatpush.msra.mxu0 %v47_v1 }
  0x10   :  { %71 = vmatpush.msra.mxu0 %v46_v2 }
  0x12   :  { %72 = vmatpush.msra.mxu0 %v45_v3 }
  0x13   :  { %88 = vmatmul.msk.f32.vlgmr.msra.gmra.mxu0 %vm53_vm0, %v44_v4 }
  0x90   :  { %v74_v6 = vpop.f32.mrf.mxu0 }
  0x91   :  { %v75_v7 = vadd.f32 %v93_v5, %v74_v6 }
  0x93   :  { %v77_v8 = vmul.f32 0.5, %v75_v7 }
  0x95   :  { %94 = vtanh.f32 %v77_v8 }
  0x9b   :  { %v95_v9 = vpop.eup %94 }
  0x9c   :  { %v79_v10 = vadd.f32 1.0, %v95_v9 }
  0x9e   :  { %v80_v11 = vmul.f32 0.5, %v79_v10 }
  0xa0   :  { %81 = vst [vmem:[%s187_s3] sm:$0xf] %v80_v11 }
  0xa1   :  { %86 = vsyncpa [#allocation3], 1 }
  0xa2   :  { %87 = vsyncpa [#allocation5], 1 }

</bundles_post_ra>
